<compile_context>
chip_gen: v6e
topology: v6e:2x2x1
jax: 0.10.0
libtpu: 0.0.40
codegen_flags: <defaults>
</compile_context>

<pallas_src>
import functools

import numpy as np
import jax
import jax.numpy as jnp
from jax.experimental import pallas as pl
from jax.experimental.pallas import tpu as pltpu


# ---------------------------------------------------------------------------
# Glue: bilinear-resize matrices (PyTorch align_corners=False rule).
# Bilinear interpolation is separable, so resize(img) == Rh @ img @ Rw.
# ---------------------------------------------------------------------------
def _resize_matrix(n_in: int, n_out: int) -> np.ndarray:
    i = np.arange(n_out, dtype=np.float64)
    src = (i + 0.5) * (n_in / n_out) - 0.5
    x0 = np.floor(src).astype(np.int64)
    frac = src - x0
    x1 = x0 + 1
    x0c = np.clip(x0, 0, n_in - 1)
    x1c = np.clip(x1, 0, n_in - 1)
    m = np.zeros((n_out, n_in), dtype=np.float64)
    np.add.at(m, (np.arange(n_out), x0c), 1.0 - frac)
    np.add.at(m, (np.arange(n_out), x1c), frac)
    return m.astype(np.float32)


# ---------------------------------------------------------------------------
# Pallas kernel: reciprocal + separable bilinear resize (MXU) + weighted avg.
# Each grid step handles TILE_B images (batch folded into the sublane/M dim
# for the big width-resize matmul); outputs are per-image 3-D slabs.
# ---------------------------------------------------------------------------
def _fused_kernel(wn_ref,
                  da_ref, db_ref, dd_ref,
                  rha_ref, rwa_ref, rhb_ref, rwb_ref, rhd_ref, rwd_ref,
                  *out_refs,
                  tb, ha, hb, hd, with_components):
    avg_ref = out_refs[0]

    w1 = wn_ref[0]          # already normalized: w_i / (w1 + w2 + w3)
    w2 = wn_ref[1]
    w3 = wn_ref[2]

    # Exact f32 reciprocal (matches PyTorch `1/disp`); store-bound kernel, so
    # this costs no wall time versus the approx EUP variant.
    inv_a = 1.0 / da_ref[...]
    inv_d = 1.0 / dd_ref[...]

    # Stage 1: batched width resize.  Batch folded into M -> one
    # (tb*Hin, Win) x (Win, Wp) f32 matmul per input, lane-dense N = Wp.
    tmp_a = jnp.dot(inv_a, rwa_ref[...],
                    preferred_element_type=jnp.float32)          # (tb*ha, Wp)
    tmp_b = jnp.dot(db_ref[...], rwb_ref[...],
                    preferred_element_type=jnp.float32)          # (tb*hb, Wp)
    tmp_d = jnp.dot(inv_d, rwd_ref[...],
                    preferred_element_type=jnp.float32)          # (tb*hd, Wp)

    # Stage 2: per-image height resize + weighted average (short static unroll).
    for b in range(tb):
        a_img = jnp.dot(rha_ref[...], tmp_a[b * ha:(b + 1) * ha, :],
                        preferred_element_type=jnp.float32)      # (H, Wp)
        b_img = jnp.dot(rhb_ref[...], tmp_b[b * hb:(b + 1) * hb, :],
                        preferred_element_type=jnp.float32)
        d_img = jnp.dot(rhd_ref[...], tmp_d[b * hd:(b + 1) * hd, :],
                        preferred_element_type=jnp.float32)

        avg = w1 * a_img + w2 * b_img + w3 * d_img               # no divide

        avg_ref[b] = avg.astype(avg_ref.dtype)
        if with_components:
            out_refs[1][b] = a_img.astype(out_refs[1].dtype)
            out_refs[2][b] = b_img.astype(out_refs[2].dtype)
            out_refs[3][b] = d_img.astype(out_refs[3].dtype)


def fused_average_depth(disp_a, depth_b, disp_d, w123, height, width, *,
                        tile_b=None, return_components=True,
                        avg_dtype=jnp.float32,
                        component_dtype=jnp.bfloat16):
    """disp_a: (B,Ha,Wa), depth_b: (B,Hb,Wb), disp_d: (B,Hd,Wd), w123: (3,) f32."""
    bsz, ha, wa = disp_a.shape
    _, hb, wb = depth_b.shape
    _, hd, wd = disp_d.shape

    # Lane-dense padded output width.  Real widths (e.g. 640) are already
    # multiples of 128 -> wp == width and the wrapper crop below is skipped.
    wp = width if width % 128 == 0 else ((width + 127) // 128) * 128

    # f32 resize matrices; width matrices zero-padded to Wp so every store is a
    # full-lane vst.
    def rw(n_in):
        m = np.zeros((n_in, wp), np.float32)
        m[:, :width] = _resize_matrix(n_in, width).T
        return jnp.asarray(m)                                 # (n_in, Wp)

    def rh(n_in):
        return jnp.asarray(_resize_matrix(n_in, height))      # (H, n_in)

    rwa_m, rwb_m, rwd_m = rw(wa), rw(wb), rw(wd)
    rha_m, rhb_m, rhd_m = rh(ha), rh(hb), rh(hd)

    n_out = 4 if return_components else 1
    avg_isize = jnp.dtype(avg_dtype).itemsize
    comp_isize = jnp.dtype(component_dtype).itemsize

    # ---- VMEM-driven batch-tile selection (v7x: ~48 MiB, v5e/v6e: ~96 MiB) ----
    try:
        phys_vmem = int(pltpu.get_tpu_info().vmem_capacity_bytes)
    except Exception:  # pragma: no cover - conservative (v7x per-TC) fallback
        phys_vmem = 64 * 1024 * 1024
    vmem_limit = min(phys_vmem * 3 // 4, 100 * 1024 * 1024)
    budget = int(vmem_limit * 0.9)

    mat_bytes = 4 * (height * (ha + hb + hd) + (wa + wb + wd) * wp)

    def est_vmem(tb):
        in_b = 4 * tb * (ha * wa + hb * wb + hd * wd)          # f32 inputs
        tmp_b = 4 * tb * (ha + hb + hd) * wp                   # stage-1 f32 temps
        out_b = tb * height * wp * (avg_isize + (n_out - 1) * comp_isize)
        # x2: double-buffered pipelined operands (matrices included — their
        # index_map is constant but the default pipeline still buffers them).
        return 2 * (in_b + out_b + mat_bytes) + tmp_b

    def legal(tb):
        if tb < 1 or bsz % tb:
            return False
        if tb == bsz:
            return True            # block == full array: always layout-legal
        # only the *folded* sublane dim (tb*H_in) needs 8-alignment
        return all((tb * hh) % 8 == 0 for hh in (ha, hb, hd))

    if tile_b is not None:
        tb = int(tile_b) if legal(int(tile_b)) else bsz
    else:
        cands = [t for t in range(1, bsz + 1) if legal(t)]
        fit_multi = [t for t in cands if t < bsz and est_vmem(t) <= budget]
        fit_any = [t for t in cands if est_vmem(t) <= budget]
        if fit_multi:              # prefer nb >= 2: pipelining + v7x megacore
            tb = max(fit_multi)
        elif fit_any:
            tb = max(fit_any)
        else:
            tb = min(cands)
    nb = bsz // tb
    vmem_limit = max(vmem_limit, min(est_vmem(tb) + (8 << 20), phys_vmem))

    # pre-normalize the weights -> removes the per-pixel divide in the kernel
    wn = (w123 / (w123[0] + w123[1] + w123[2])).astype(jnp.float32)

    # fold batch into the sublane/M dim for the stage-1 matmuls (free reshape)
    da2 = disp_a.reshape(bsz * ha, wa)
    db2 = depth_b.reshape(bsz * hb, wb)
    dd2 = disp_d.reshape(bsz * hd, wd)

    in_specs = [
        pl.BlockSpec(memory_space=pltpu.MemorySpace.SMEM),      # normalized w (3,)
        pl.BlockSpec((tb * ha, wa), lambda i: (i, 0)),          # disp_A (folded)
        pl.BlockSpec((tb * hb, wb), lambda i: (i, 0)),          # depth_B (folded)
        pl.BlockSpec((tb * hd, wd), lambda i: (i, 0)),          # disp_D (folded)
        pl.BlockSpec(rha_m.shape, lambda i: (0, 0)),
        pl.BlockSpec(rwa_m.shape, lambda i: (0, 0)),
        pl.BlockSpec(rhb_m.shape, lambda i: (0, 0)),
        pl.BlockSpec(rwb_m.shape, lambda i: (0, 0)),
        pl.BlockSpec(rhd_m.shape, lambda i: (0, 0)),
        pl.BlockSpec(rwd_m.shape, lambda i: (0, 0)),
    ]

    out_spec = pl.BlockSpec((tb, height, wp), lambda i: (i, 0, 0))
    out_shapes = [jax.ShapeDtypeStruct((bsz, height, wp), avg_dtype)]
    if return_components:
        out_shapes += [jax.ShapeDtypeStruct((bsz, height, wp), component_dtype)] * 3

    kernel = functools.partial(
        _fused_kernel, tb=tb, ha=ha, hb=hb, hd=hd,
        with_components=return_components)

    outs = pl.pallas_call(
        kernel,
        grid=(nb,),
        in_specs=in_specs,
        out_specs=[out_spec] * n_out,
        out_shape=out_shapes,
        compiler_params=pltpu.CompilerParams(
            dimension_semantics=("parallel",),     # megacore-shardable (nb >= 2)
            vmem_limit_bytes=int(vmem_limit)),
    )(wn, da2, db2, dd2, rha_m, rwa_m, rhb_m, rwb_m, rhd_m, rwd_m)

    def crop(t):
        # Only slice when W was actually padded (avoids an extra full HBM pass
        # at real widths, which are already 128-multiples).
        return t if wp == width else t[:, :, :width]

    return tuple(crop(t) for t in outs)


# ---------------------------------------------------------------------------
# Deterministic stand-ins for the three backbones (plain-JAX glue).
# ---------------------------------------------------------------------------
def _stub_dispnet(x, w_chan):
    # DispNetS stand-in: 2x2 avg-pool then channel mix -> disparity (B,H/2,W/2)
    b, c, h, w = x.shape
    pooled = x.reshape(b, c, h // 2, 2, w // 2, 2).mean(axis=(3, 5))
    feat = jnp.einsum('bchw,c->bhw', pooled, w_chan)
    return jax.nn.sigmoid(feat) * 0.3 + 0.01


def _stub_adabins(x, w_chan, out_hw):
    # AdaBins stand-in: resize to its working res, channel mix -> depth
    b, c, _, _ = x.shape
    xr = jax.image.resize(x, (b, c, out_hw[0], out_hw[1]), method='bilinear')
    feat = jnp.einsum('bchw,c->bhw', xr, w_chan)
    return jax.nn.softplus(feat) + 0.001


def _stub_monodepth2(x, w_chan, out_hw):
    # monodepth2 stand-in: resize to its working res, channel mix -> disparity
    b, c, _, _ = x.shape
    xr = jax.image.resize(x, (b, c, out_hw[0], out_hw[1]), method='bilinear')
    feat = jnp.einsum('bchw,c->bhw', xr, w_chan)
    return jax.nn.sigmoid(feat) * 0.9 + 0.01


def average_depth_forward(x, w_1, w_2, w_3, height, width, params, *,
                          tile_b=None, return_components=True,
                          component_dtype=jnp.bfloat16):
    """Eval-mode AverageDepth.forward. x: (B, C, H, W) NCHW float32.

    Returns [average_depth, depth_A, depth_B, depth_D] (NCHW, 1 channel).
    Pass return_components=False on store-bound inference paths to emit only
    the averaged depth; component_dtype=jnp.float32 restores strict parity.
    """
    disp_a = _stub_dispnet(x, params['wa'])                        # (B, Ha, Wa)
    depth_b = _stub_adabins(x, params['wb'], params['adabin_hw'])  # (B, Hb, Wb)
    disp_d = _stub_monodepth2(x, params['wd'], params['mono_hw'])  # (B, Hd, Wd)

    w123 = jnp.stack([jnp.float32(w_1), jnp.float32(w_2), jnp.float32(w_3)])
    outs = fused_average_depth(disp_a, depth_b, disp_d, w123, height, width,
                               tile_b=tile_b,
                               return_components=return_components,
                               component_dtype=component_dtype)

    expand = lambda t: t[:, None, :, :]           # restore NCHW (B,1,H,W)
    return [expand(t) for t in outs]


if __name__ == "__main__":
    key = jax.random.PRNGKey(0)
    k_x, k_wa, k_wb, k_wd = jax.random.split(key, 4)

    B, C, H, W = 4, 3, 16, 16
    x = jax.random.normal(k_x, (B, C, H, W), dtype=jnp.float32)
    w_1, w_2, w_3 = 0.5, 0.3, 0.2

    params = {
        'wa': jax.random.normal(k_wa, (C,), dtype=jnp.float32),
        'wb': jax.random.normal(k_wb, (C,), dtype=jnp.float32),
        'wd': jax.random.normal(k_wd, (C,), dtype=jnp.float32),
        'adabin_hw': (16, 24),   # scaled-down stand-in for (416, 544)
        'mono_hw': (8, 24),      # scaled-down stand-in for (192, 640)
    }

    outs = average_depth_forward(x, w_1, w_2, w_3, H, W, params)
    outs = jax.block_until_ready(outs)

    # Plain-JAX f32 reference of the fused path (exact reciprocal, f32 resize).
    disp_a = _stub_dispnet(x, params['wa'])
    depth_b = _stub_adabins(x, params['wb'], params['adabin_hw'])
    disp_d = _stub_monodepth2(x, params['wd'], params['mono_hw'])

    def ref_resize(img, hout, wout):
        rh = jnp.asarray(_resize_matrix(img.shape[1], hout))
        rw = jnp.asarray(_resize_matrix(img.shape[2], wout).T)
        return jnp.einsum('oh,bhw,wp->bop', rh, img, rw)

    ra = ref_resize(1.0 / disp_a, H, W)
    rb = ref_resize(depth_b, H, W)
    rd = ref_resize(1.0 / disp_d, H, W)
    ravg = (w_1 * ra + w_2 * rb + w_3 * rd) / (w_1 + w_2 + w_3)

    # averaged depth is computed f32 end-to-end in the kernel (exact reciprocal,
    # f32 matmuls); components are stored in bf16 -> looser tolerance for those.
    np.testing.assert_allclose(np.asarray(outs[0][:, 0]), np.asarray(ravg),
                               rtol=1e-2, atol=1e-2)
    comp_tol = dict(rtol=2e-2, atol=2e-2)
    np.testing.assert_allclose(np.asarray(outs[1][:, 0], dtype=np.float32),
                               np.asarray(ra), **comp_tol)
    np.testing.assert_allclose(np.asarray(outs[2][:, 0], dtype=np.float32),
                               np.asarray(rb), **comp_tol)
    np.testing.assert_allclose(np.asarray(outs[3][:, 0], dtype=np.float32),
                               np.asarray(rd), **comp_tol)

    print("KERNEL_OK")
</pallas_src>

<mosaic_0001>
module attributes {stable_mosaic.version = 11 : i64} {
  func.func @_fused_kernel(%arg0: i32, %arg1: memref<3xf32, #tpu.memory_space<smem>>, %arg2: memref<16x8xf32, #tpu.memory_space<vmem>>, %arg3: memref<32x24xf32, #tpu.memory_space<vmem>>, %arg4: memref<16x24xf32, #tpu.memory_space<vmem>>, %arg5: memref<16x8xf32, #tpu.memory_space<vmem>>, %arg6: memref<8x128xf32, #tpu.memory_space<vmem>>, %arg7: memref<16x16xf32, #tpu.memory_space<vmem>>, %arg8: memref<24x128xf32, #tpu.memory_space<vmem>>, %arg9: memref<16x8xf32, #tpu.memory_space<vmem>>, %arg10: memref<24x128xf32, #tpu.memory_space<vmem>>, %arg11: memref<2x16x128xf32, #tpu.memory_space<vmem>>, %arg12: memref<2x16x128xbf16, #tpu.memory_space<vmem>>, %arg13: memref<2x16x128xbf16, #tpu.memory_space<vmem>>, %arg14: memref<2x16x128xbf16, #tpu.memory_space<vmem>>) attributes {dimension_semantics = [#tpu.dimension_semantics<parallel>], iteration_bounds = array<i64: 2>, scalar_prefetch = 0 : i64, scratch_operands = 0 : i64, tpu.core_type = #tpu.core_type<tc>, window_params = [{transform_indices = @transform_0, window_bounds = array<i64: 3>}, {transform_indices = @transform_1, window_bounds = array<i64: 16, 8>}, {transform_indices = @transform_2, window_bounds = array<i64: 32, 24>}, {transform_indices = @transform_3, window_bounds = array<i64: 16, 24>}, {pipeline_mode = #tpu.pipeline_mode<synchronous>, transform_indices = @transform_4, window_bounds = array<i64: 16, 8>}, {pipeline_mode = #tpu.pipeline_mode<synchronous>, transform_indices = @transform_5, window_bounds = array<i64: 8, 128>}, {pipeline_mode = #tpu.pipeline_mode<synchronous>, transform_indices = @transform_6, window_bounds = array<i64: 16, 16>}, {pipeline_mode = #tpu.pipeline_mode<synchronous>, transform_indices = @transform_7, window_bounds = array<i64: 24, 128>}, {pipeline_mode = #tpu.pipeline_mode<synchronous>, transform_indices = @transform_8, window_bounds = array<i64: 16, 8>}, {pipeline_mode = #tpu.pipeline_mode<synchronous>, transform_indices = @transform_9, window_bounds = array<i64: 24, 128>}, {transform_indices = @transform_10, window_bounds = array<i64: 2, 16, 128>}, {transform_indices = @transform_11, window_bounds = array<i64: 2, 16, 128>}, {transform_indices = @transform_12, window_bounds = array<i64: 2, 16, 128>}, {transform_indices = @transform_13, window_bounds = array<i64: 2, 16, 128>}]} {
    %c0 = arith.constant 0 : index
    %0 = memref.load %arg1[%c0] : memref<3xf32, #tpu.memory_space<smem>>
    %c1 = arith.constant 1 : index
    %1 = memref.load %arg1[%c1] : memref<3xf32, #tpu.memory_space<smem>>
    %c2 = arith.constant 2 : index
    %2 = memref.load %arg1[%c2] : memref<3xf32, #tpu.memory_space<smem>>
    %c0_0 = arith.constant 0 : index
    %c0_1 = arith.constant 0 : index
    %3 = vector.load %arg2[%c0_0, %c0_1] : memref<16x8xf32, #tpu.memory_space<vmem>>, vector<16x8xf32>
    %cst = arith.constant 1.000000e+00 : f32
    %4 = vector.broadcast %cst : f32 to vector<16x8xf32>
    %5 = arith.divf %4, %3 : vector<16x8xf32>
    %c0_2 = arith.constant 0 : index
    %c0_3 = arith.constant 0 : index
    %6 = vector.load %arg4[%c0_2, %c0_3] : memref<16x24xf32, #tpu.memory_space<vmem>>, vector<16x24xf32>
    %cst_4 = arith.constant 1.000000e+00 : f32
    %7 = vector.broadcast %cst_4 : f32 to vector<16x24xf32>
    %8 = arith.divf %7, %6 : vector<16x24xf32>
    %c0_5 = arith.constant 0 : index
    %c0_6 = arith.constant 0 : index
    %9 = vector.load %arg6[%c0_5, %c0_6] : memref<8x128xf32, #tpu.memory_space<vmem>>, vector<8x128xf32>
    %cst_7 = arith.constant dense<0.000000e+00> : vector<16x128xf32>
    %10 = tpu.matmul %5, %9, %cst_7 {dimension_numbers = #tpu.dot_dimension_numbers<[1], [0], [0], [1], [0, 0, 1, 1], [], []>} : vector<16x8xf32>, vector<8x128xf32>, vector<16x128xf32> -> vector<16x128xf32>
    %c0_8 = arith.constant 0 : index
    %c0_9 = arith.constant 0 : index
    %11 = vector.load %arg3[%c0_8, %c0_9] : memref<32x24xf32, #tpu.memory_space<vmem>>, vector<32x24xf32>
    %c0_10 = arith.constant 0 : index
    %c0_11 = arith.constant 0 : index
    %12 = vector.load %arg8[%c0_10, %c0_11] : memref<24x128xf32, #tpu.memory_space<vmem>>, vector<24x128xf32>
    %cst_12 = arith.constant dense<0.000000e+00> : vector<32x128xf32>
    %13 = tpu.matmul %11, %12, %cst_12 {dimension_numbers = #tpu.dot_dimension_numbers<[1], [0], [0], [1], [0, 0, 1, 1], [], []>} : vector<32x24xf32>, vector<24x128xf32>, vector<32x128xf32> -> vector<32x128xf32>
    %c0_13 = arith.constant 0 : index
    %c0_14 = arith.constant 0 : index
    %14 = vector.load %arg10[%c0_13, %c0_14] : memref<24x128xf32, #tpu.memory_space<vmem>>, vector<24x128xf32>
    %cst_15 = arith.constant dense<0.000000e+00> : vector<16x128xf32>
    %15 = tpu.matmul %8, %14, %cst_15 {dimension_numbers = #tpu.dot_dimension_numbers<[1], [0], [0], [1], [0, 0, 1, 1], [], []>} : vector<16x24xf32>, vector<24x128xf32>, vector<16x128xf32> -> vector<16x128xf32>
    %c0_16 = arith.constant 0 : index
    %c0_17 = arith.constant 0 : index
    %16 = vector.load %arg5[%c0_16, %c0_17] : memref<16x8xf32, #tpu.memory_space<vmem>>, vector<16x8xf32>
    %17 = vector.extract_strided_slice %10 {offsets = [0, 0], sizes = [8, 128], strides = [1, 1]} : vector<16x128xf32> to vector<8x128xf32>
    %cst_18 = arith.constant dense<0.000000e+00> : vector<16x128xf32>
    %18 = tpu.matmul %16, %17, %cst_18 {dimension_numbers = #tpu.dot_dimension_numbers<[1], [0], [0], [1], [0, 0, 1, 1], [], []>} : vector<16x8xf32>, vector<8x128xf32>, vector<16x128xf32> -> vector<16x128xf32>
    %c0_19 = arith.constant 0 : index
    %c0_20 = arith.constant 0 : index
    %19 = vector.load %arg7[%c0_19, %c0_20] : memref<16x16xf32, #tpu.memory_space<vmem>>, vector<16x16xf32>
    %20 = vector.extract_strided_slice %13 {offsets = [0, 0], sizes = [16, 128], strides = [1, 1]} : vector<32x128xf32> to vector<16x128xf32>
    %cst_21 = arith.constant dense<0.000000e+00> : vector<16x128xf32>
    %21 = tpu.matmul %19, %20, %cst_21 {dimension_numbers = #tpu.dot_dimension_numbers<[1], [0], [0], [1], [0, 0, 1, 1], [], []>} : vector<16x16xf32>, vector<16x128xf32>, vector<16x128xf32> -> vector<16x128xf32>
    %c0_22 = arith.constant 0 : index
    %c0_23 = arith.constant 0 : index
    %22 = vector.load %arg9[%c0_22, %c0_23] : memref<16x8xf32, #tpu.memory_space<vmem>>, vector<16x8xf32>
    %23 = vector.extract_strided_slice %15 {offsets = [0, 0], sizes = [8, 128], strides = [1, 1]} : vector<16x128xf32> to vector<8x128xf32>
    %cst_24 = arith.constant dense<0.000000e+00> : vector<16x128xf32>
    %24 = tpu.matmul %22, %23, %cst_24 {dimension_numbers = #tpu.dot_dimension_numbers<[1], [0], [0], [1], [0, 0, 1, 1], [], []>} : vector<16x8xf32>, vector<8x128xf32>, vector<16x128xf32> -> vector<16x128xf32>
    %25 = vector.broadcast %0 : f32 to vector<16x128xf32>
    %26 = arith.mulf %25, %18 : vector<16x128xf32>
    %27 = vector.broadcast %1 : f32 to vector<16x128xf32>
    %28 = arith.mulf %27, %21 : vector<16x128xf32>
    %29 = arith.addf %26, %28 : vector<16x128xf32>
    %30 = vector.broadcast %2 : f32 to vector<16x128xf32>
    %31 = arith.mulf %30, %24 : vector<16x128xf32>
    %32 = arith.addf %29, %31 : vector<16x128xf32>
    %c0_25 = arith.constant 0 : index
    %c0_26 = arith.constant 0 : index
    %c0_27 = arith.constant 0 : index
    %33 = vector.load %arg11[%c0_25, %c0_26, %c0_27] : memref<2x16x128xf32, #tpu.memory_space<vmem>>, vector<1x16x128xf32>
    %34 = vector.shape_cast %33 : vector<1x16x128xf32> to vector<16x128xf32>
    %35 = vector.shape_cast %32 : vector<16x128xf32> to vector<1x16x128xf32>
    tpu.vector_store %arg11[%c0_25, %c0_26, %c0_27], %35 {strides = array<i32>} : memref<2x16x128xf32, #tpu.memory_space<vmem>>, vector<1x16x128xf32>,
    %36 = arith.truncf %18 : vector<16x128xf32> to vector<16x128xbf16>
    %c0_28 = arith.constant 0 : index
    %c0_29 = arith.constant 0 : index
    %c0_30 = arith.constant 0 : index
    %37 = vector.load %arg12[%c0_28, %c0_29, %c0_30] : memref<2x16x128xbf16, #tpu.memory_space<vmem>>, vector<1x16x128xbf16>
    %38 = vector.shape_cast %37 : vector<1x16x128xbf16> to vector<16x128xbf16>
    %39 = vector.shape_cast %36 : vector<16x128xbf16> to vector<1x16x128xbf16>
    tpu.vector_store %arg12[%c0_28, %c0_29, %c0_30], %39 {strides = array<i32>} : memref<2x16x128xbf16, #tpu.memory_space<vmem>>, vector<1x16x128xbf16>,
    %40 = arith.truncf %21 : vector<16x128xf32> to vector<16x128xbf16>
    %c0_31 = arith.constant 0 : index
    %c0_32 = arith.constant 0 : index
    %c0_33 = arith.constant 0 : index
    %41 = vector.load %arg13[%c0_31, %c0_32, %c0_33] : memref<2x16x128xbf16, #tpu.memory_space<vmem>>, vector<1x16x128xbf16>
    %42 = vector.shape_cast %41 : vector<1x16x128xbf16> to vector<16x128xbf16>
    %43 = vector.shape_cast %40 : vector<16x128xbf16> to vector<1x16x128xbf16>
    tpu.vector_store %arg13[%c0_31, %c0_32, %c0_33], %43 {strides = array<i32>} : memref<2x16x128xbf16, #tpu.memory_space<vmem>>, vector<1x16x128xbf16>,
    %44 = arith.truncf %24 : vector<16x128xf32> to vector<16x128xbf16>
    %c0_34 = arith.constant 0 : index
    %c0_35 = arith.constant 0 : index
    %c0_36 = arith.constant 0 : index
    %45 = vector.load %arg14[%c0_34, %c0_35, %c0_36] : memref<2x16x128xbf16, #tpu.memory_space<vmem>>, vector<1x16x128xbf16>
    %46 = vector.shape_cast %45 : vector<1x16x128xbf16> to vector<16x128xbf16>
    %47 = vector.shape_cast %44 : vector<16x128xbf16> to vector<1x16x128xbf16>
    tpu.vector_store %arg14[%c0_34, %c0_35, %c0_36], %47 {strides = array<i32>} : memref<2x16x128xbf16, #tpu.memory_space<vmem>>, vector<1x16x128xbf16>,
    %c0_37 = arith.constant 0 : index
    %c0_38 = arith.constant 0 : index
    %48 = vector.load %arg5[%c0_37, %c0_38] : memref<16x8xf32, #tpu.memory_space<vmem>>, vector<16x8xf32>
    %49 = vector.extract_strided_slice %10 {offsets = [8, 0], sizes = [8, 128], strides = [1, 1]} : vector<16x128xf32> to vector<8x128xf32>
    %cst_39 = arith.constant dense<0.000000e+00> : vector<16x128xf32>
    %50 = tpu.matmul %48, %49, %cst_39 {dimension_numbers = #tpu.dot_dimension_numbers<[1], [0], [0], [1], [0, 0, 1, 1], [], []>} : vector<16x8xf32>, vector<8x128xf32>, vector<16x128xf32> -> vector<16x128xf32>
    %c0_40 = arith.constant 0 : index
    %c0_41 = arith.constant 0 : index
    %51 = vector.load %arg7[%c0_40, %c0_41] : memref<16x16xf32, #tpu.memory_space<vmem>>, vector<16x16xf32>
    %52 = vector.extract_strided_slice %13 {offsets = [16, 0], sizes = [16, 128], strides = [1, 1]} : vector<32x128xf32> to vector<16x128xf32>
    %cst_42 = arith.constant dense<0.000000e+00> : vector<16x128xf32>
    %53 = tpu.matmul %51, %52, %cst_42 {dimension_numbers = #tpu.dot_dimension_numbers<[1], [0], [0], [1], [0, 0, 1, 1], [], []>} : vector<16x16xf32>, vector<16x128xf32>, vector<16x128xf32> -> vector<16x128xf32>
    %c0_43 = arith.constant 0 : index
    %c0_44 = arith.constant 0 : index
    %54 = vector.load %arg9[%c0_43, %c0_44] : memref<16x8xf32, #tpu.memory_space<vmem>>, vector<16x8xf32>
    %55 = vector.extract_strided_slice %15 {offsets = [8, 0], sizes = [8, 128], strides = [1, 1]} : vector<16x128xf32> to vector<8x128xf32>
    %cst_45 = arith.constant dense<0.000000e+00> : vector<16x128xf32>
    %56 = tpu.matmul %54, %55, %cst_45 {dimension_numbers = #tpu.dot_dimension_numbers<[1], [0], [0], [1], [0, 0, 1, 1], [], []>} : vector<16x8xf32>, vector<8x128xf32>, vector<16x128xf32> -> vector<16x128xf32>
    %57 = vector.broadcast %0 : f32 to vector<16x128xf32>
    %58 = arith.mulf %57, %50 : vector<16x128xf32>
    %59 = vector.broadcast %1 : f32 to vector<16x128xf32>
    %60 = arith.mulf %59, %53 : vector<16x128xf32>
    %61 = arith.addf %58, %60 : vector<16x128xf32>
    %62 = vector.broadcast %2 : f32 to vector<16x128xf32>
    %63 = arith.mulf %62, %56 : vector<16x128xf32>
    %64 = arith.addf %61, %63 : vector<16x128xf32>
    %c1_46 = arith.constant 1 : index
    %c0_47 = arith.constant 0 : index
    %c0_48 = arith.constant 0 : index
    %65 = vector.load %arg11[%c1_46, %c0_47, %c0_48] : memref<2x16x128xf32, #tpu.memory_space<vmem>>, vector<1x16x128xf32>
    %66 = vector.shape_cast %65 : vector<1x16x128xf32> to vector<16x128xf32>
    %67 = vector.shape_cast %64 : vector<16x128xf32> to vector<1x16x128xf32>
    tpu.vector_store %arg11[%c1_46, %c0_47, %c0_48], %67 {strides = array<i32>} : memref<2x16x128xf32, #tpu.memory_space<vmem>>, vector<1x16x128xf32>,
    %68 = arith.truncf %50 : vector<16x128xf32> to vector<16x128xbf16>
    %c1_49 = arith.constant 1 : index
    %c0_50 = arith.constant 0 : index
    %c0_51 = arith.constant 0 : index
    %69 = vector.load %arg12[%c1_49, %c0_50, %c0_51] : memref<2x16x128xbf16, #tpu.memory_space<vmem>>, vector<1x16x128xbf16>
    %70 = vector.shape_cast %69 : vector<1x16x128xbf16> to vector<16x128xbf16>
    %71 = vector.shape_cast %68 : vector<16x128xbf16> to vector<1x16x128xbf16>
    tpu.vector_store %arg12[%c1_49, %c0_50, %c0_51], %71 {strides = array<i32>} : memref<2x16x128xbf16, #tpu.memory_space<vmem>>, vector<1x16x128xbf16>,
    %72 = arith.truncf %53 : vector<16x128xf32> to vector<16x128xbf16>
    %c1_52 = arith.constant 1 : index
    %c0_53 = arith.constant 0 : index
    %c0_54 = arith.constant 0 : index
    %73 = vector.load %arg13[%c1_52, %c0_53, %c0_54] : memref<2x16x128xbf16, #tpu.memory_space<vmem>>, vector<1x16x128xbf16>
    %74 = vector.shape_cast %73 : vector<1x16x128xbf16> to vector<16x128xbf16>
    %75 = vector.shape_cast %72 : vector<16x128xbf16> to vector<1x16x128xbf16>
    tpu.vector_store %arg13[%c1_52, %c0_53, %c0_54], %75 {strides = array<i32>} : memref<2x16x128xbf16, #tpu.memory_space<vmem>>, vector<1x16x128xbf16>,
    %76 = arith.truncf %56 : vector<16x128xf32> to vector<16x128xbf16>
    %c1_55 = arith.constant 1 : index
    %c0_56 = arith.constant 0 : index
    %c0_57 = arith.constant 0 : index
    %77 = vector.load %arg14[%c1_55, %c0_56, %c0_57] : memref<2x16x128xbf16, #tpu.memory_space<vmem>>, vector<1x16x128xbf16>
    %78 = vector.shape_cast %77 : vector<1x16x128xbf16> to vector<16x128xbf16>
    %79 = vector.shape_cast %76 : vector<16x128xbf16> to vector<1x16x128xbf16>
    tpu.vector_store %arg14[%c1_55, %c0_56, %c0_57], %79 {strides = array<i32>} : memref<2x16x128xbf16, #tpu.memory_space<vmem>>, vector<1x16x128xbf16>,
    return
  }
  func.func @transform_0(%arg0: i32) -> i32 {
    %c0_i32 = arith.constant 0 : i32
    %c0_i32_0 = arith.constant 0 : i32
    return %c0_i32 : i32
  }
  func.func @transform_1(%arg0: i32) -> (i32, i32) {
    %c0_i32 = arith.constant 0 : i32
    %c0_i32_0 = arith.constant 0 : i32
    return %arg0, %c0_i32 : i32, i32
  }
  func.func @transform_2(%arg0: i32) -> (i32, i32) {
    %c0_i32 = arith.constant 0 : i32
    %c0_i32_0 = arith.constant 0 : i32
    return %arg0, %c0_i32 : i32, i32
  }
  func.func @transform_3(%arg0: i32) -> (i32, i32) {
    %c0_i32 = arith.constant 0 : i32
    %c0_i32_0 = arith.constant 0 : i32
    return %arg0, %c0_i32 : i32, i32
  }
  func.func @transform_4(%arg0: i32) -> (i32, i32) {
    %c0_i32 = arith.constant 0 : i32
    %c0_i32_0 = arith.constant 0 : i32
    %c0_i32_1 = arith.constant 0 : i32
    return %c0_i32, %c0_i32_0 : i32, i32
  }
  func.func @transform_5(%arg0: i32) -> (i32, i32) {
    %c0_i32 = arith.constant 0 : i32
    %c0_i32_0 = arith.constant 0 : i32
    %c0_i32_1 = arith.constant 0 : i32
    return %c0_i32, %c0_i32_0 : i32, i32
  }
  func.func @transform_6(%arg0: i32) -> (i32, i32) {
    %c0_i32 = arith.constant 0 : i32
    %c0_i32_0 = arith.constant 0 : i32
    %c0_i32_1 = arith.constant 0 : i32
    return %c0_i32, %c0_i32_0 : i32, i32
  }
  func.func @transform_7(%arg0: i32) -> (i32, i32) {
    %c0_i32 = arith.constant 0 : i32
    %c0_i32_0 = arith.constant 0 : i32
    %c0_i32_1 = arith.constant 0 : i32
    return %c0_i32, %c0_i32_0 : i32, i32
  }
  func.func @transform_8(%arg0: i32) -> (i32, i32) {
    %c0_i32 = arith.constant 0 : i32
    %c0_i32_0 = arith.constant 0 : i32
    %c0_i32_1 = arith.constant 0 : i32
    return %c0_i32, %c0_i32_0 : i32, i32
  }
  func.func @transform_9(%arg0: i32) -> (i32, i32) {
    %c0_i32 = arith.constant 0 : i32
    %c0_i32_0 = arith.constant 0 : i32
    %c0_i32_1 = arith.constant 0 : i32
    return %c0_i32, %c0_i32_0 : i32, i32
  }
  func.func @transform_10(%arg0: i32) -> (i32, i32, i32) {
    %c0_i32 = arith.constant 0 : i32
    %c0_i32_0 = arith.constant 0 : i32
    %c0_i32_1 = arith.constant 0 : i32
    return %arg0, %c0_i32, %c0_i32_0 : i32, i32, i32
  }
  func.func @transform_11(%arg0: i32) -> (i32, i32, i32) {
    %c0_i32 = arith.constant 0 : i32
    %c0_i32_0 = arith.constant 0 : i32
    %c0_i32_1 = arith.constant 0 : i32
    return %arg0, %c0_i32, %c0_i32_0 : i32, i32, i32
  }
  func.func @transform_12(%arg0: i32) -> (i32, i32, i32) {
    %c0_i32 = arith.constant 0 : i32
    %c0_i32_0 = arith.constant 0 : i32
    %c0_i32_1 = arith.constant 0 : i32
    return %arg0, %c0_i32, %c0_i32_0 : i32, i32, i32
  }
  func.func @transform_13(%arg0: i32) -> (i32, i32, i32) {
    %c0_i32 = arith.constant 0 : i32
    %c0_i32_0 = arith.constant 0 : i32
    %c0_i32_1 = arith.constant 0 : i32
    return %arg0, %c0_i32, %c0_i32_0 : i32, i32, i32
  }
}

</mosaic_0001>

<bundles_post_ra>
// kernel: tpu_custom_call.1
= control target key start
LH: loop header
LB: loop body
LE: loop exit
PB: predicated region body
PF: predicated region fallthrough
CT: control target
= control target key end

     0   :  { %s2584_s0 = inlined_call_operand.vmem [shape: f32[3], index: 0, kind: input, shape index: {}]   ;;  %s2585_s1 = inlined_call_operand.vmem [shape: f32[32,8], index: 1, kind: input, shape index: {}]   ;;  %s2586_s2 = inlined_call_operand.vmem [shape: f32[64,24], index: 2, kind: input, shape index: {}]   ;;  %s2587_s3 = inlined_call_operand.vmem [shape: f32[32,24], index: 3, kind: input, shape index: {}]   ;;  %s2588_s4 = inlined_call_operand.vmem [shape: f32[16,8], index: 4, kind: input, shape index: {}]   ;;  %s2589_s5 = inlined_call_operand.vmem [shape: f32[8,128], index: 5, kind: input, shape index: {}]   ;;  %s2590_s6 = inlined_call_operand.vmem [shape: f32[16,16], index: 6, kind: input, shape index: {}]   ;;  %s2591_s7 = inlined_call_operand.vmem [shape: f32[24,128], index: 7, kind: input, shape index: {}]   ;;  %s2592_s8 = inlined_call_operand.vmem [shape: f32[16,8], index: 8, kind: input, shape index: {}]   ;;  %s2593_s9 = inlined_call_operand.vmem [shape: f32[24,128], index: 9, kind: input, shape index: {}]   ;;  %s2594_s10 = inlined_call_operand.hbm [shape: f32[4,16,128], index: 10, kind: output, shape index: {0}]   ;;  %s2595_s11 = inlined_call_operand.hbm [shape: bf16[4,16,128], index: 11, kind: output, shape index: {1}]   ;;  %s2596_s12 = inlined_call_operand.hbm [shape: bf16[4,16,128], index: 12, kind: output, shape index: {2}]   ;;  %s2597_s13 = inlined_call_operand.hbm [shape: bf16[4,16,128], index: 13, kind: output, shape index: {3}]  }
   0x1   :  { %2604 = sst [smem:[#allocation17_spill]] %s2584_s0 }
   0x2   :  { %2605 = sst [smem:[#allocation18_spill]] %s2585_s1 }
   0x3   :  { %2606 = sst [smem:[#allocation19_spill]] %s2586_s2 }
   0x4   :  { %2607 = sst [smem:[#allocation20_spill]] %s2587_s3 }
   0x5   :  { %2608 = sst [smem:[#allocation21_spill]] %s2588_s4 }
   0x6   :  { %2609 = sst [smem:[#allocation22_spill]] %s2589_s5 }
   0x7   :  { %2610 = sst [smem:[#allocation23_spill]] %s2591_s7 }
   0x8   :  { %19 = vsyncpa [#allocation4], 0 }
   0x9   :  { %20 = vsyncpa [#allocation3], 0 }
   0xa   :  { %22 = vsyncpa [#allocation3 + $0x1], 0 }
   0xb   :  { %23 = vsyncpa [#allocation7], 0 }
   0xc   :  { %25 = vsyncpa [#allocation7 + $0x1], 0 }
   0xd   :  { %26 = vsyncpa [#allocation10], 0 }
   0xe   :  { %28 = vsyncpa [#allocation10 + $0x1], 0  ;;  %s2227_s25 = smov 0   ;;  %s2229_s26 = smov 0  }
   0xf   :  { %s2231_s27 = smov 0   ;;  %s2233_s28 = smov 0  }
  0x10 LB: > { %2611 = sst [smem:[#allocation15_spill]] %s2142_s27  ;;  %s2248_s29 = sadd.s32 4294967295, %s2146_s28   ;;  %s2146_s28 = sphi %s2233_s28, %s2635_s28   ;;  %s2142_s27 = sphi %s2231_s27, %s2632_s27   ;;  %s2138_s26 = sphi %s2229_s26, %s2634_s26   ;;  %s2134_s25 = sphi %s2227_s25, %s2633_s25  }
  0x11   : > { %s2598_s30 = sadd.s32 4294967294, %s2146_s28   ;;  %s2252_s14 = sadd.s32 1, %s2146_s28  }
  0x12   : > { %s266_s15 = sadd.s32 1, %s2142_s27  ;;  %s263_s16 = ssub.s32 %s2146_s28, %s2252_s14 }
  0x13   : > { %p276_p0 = scmp.ne.s32.totalorder %s2142_s27, %s2138_s26  ;;  %p264_p1 = scmp.eq.s32.totalorder %s263_s16, 0 }
  0x14   : > { %p277_p2 = scmp.eq.s32.totalorder %s2248_s29, 1  ;;  %p282_p3 = scmp.ne.s32.totalorder %s2138_s26, %s2134_s25 }
  0x15   : > { %p283_p4 = scmp.eq.s32.totalorder %s2598_s30, 1  ;;  %p1681_p7 = scmp.ge.s32.totalorder %s2146_s28, 1 }
  0x16   : > { %s2265_s17 = scalar_select %p264_p1, %s2142_s27, %s266_s15  }
  0x17   : > { %p2267_p5 = por %p277_p2, %p276_p0  ;;  %p2271_p6 = por %p283_p4, %p282_p3 }
  0x18   : > { %2612 = sst [smem:[#allocation16_spill]] %s2265_s17  ;;  %p368_p8 = scmp.lt.s32.totalorder %s2146_s28, 3 }
  0x19   : > { %p1933_p9 = scmp.eq.s32.totalorder %s2248_s29, 0  ;;  %s2616_s0 = sld [smem:[#allocation17_spill]] }
  0x1a   : > { %p2278_p10 = pnand %p1681_p7, %p368_p8 }
  0x1c   : > { %p1916_p11 = pneg %p2278_p10 }
  0x1e   : > { %p1917_p12 = pnand %p1933_p9, %p1916_p11 }
  0x1f   : > { %s381_s23 = sshll.u32 %s2616_s0, 4  ;;  %s382_s23 = int_to_ptr.vmem [resolvable:$true] %s381_s23 }
  0x20   : > { %s1981_s24 = scalar_lea.vmem %s382_s23, 16  ;;  %p1983_p0 = pneg %p1917_p12 }
  0x21   : > { %p1982_p13 = scmp.ne.s32.totalorder %s382_s23, %s1981_s24  ;;  %p1989_p3 = scmp.lt.s32.totalorder %s382_s23, %s382_s23 }
  0x22   : > { %p1990_p4 = scmp.lt.s32.totalorder %s1981_s24, %s1981_s24 }
  0x23   : > { %p1984_p1 = pnand %p1983_p0, %p1982_p13 }
  0x24   : > { %p1991_p7 = por %p1990_p4, %p1989_p3 }
  0x25   : > { %p1985_p2 = pneg %p1984_p1 }
  0x27   : > { %p1992_p8 = pnand %p1991_p7, %p1985_p2 }
  0x29   : > { %1995 = shalt.err (!%p1992_p8)
}
  0x2a   : > { %s2148_s15 = smov [#allocation2]   ;;  %439 = sbr.rel (%p2278_p10) target bundleno = 565 (0x235), region = 60 }
  0x2b   : > { %1919 = dma.vmem_to_smem (!%p1917_p12), %s382_s23, 16, %s2148_s15, [#allocation4]  }
  0x2f   : > { %2117 = dma.done.wait (%p1933_p9), [#allocation4], 16  }
  0x30   : > { %2119 = vsyncadd (%p1933_p9), [#allocation4], 4294967280 }
  0x31   : > { %445 = sfence }
  0x32   : > { %s2617_s7 = sld [smem:[#allocation23_spill]]  ;;  %s1692_s23 = sshll.u32 %s2248_s29, 2  ;;  %v736_v3 = vld [vmem:[%s2593_s9 + $0x10] sm:$0xff]  ;;  %vm636_vm0 = vcmask 195584   ;;  %vm547_vm1 = vcmask 64512   ;;  %v735_v15 = vld [vmem:[%s2593_s9 + $0x8] sm:$0xff] }
  0x33   : > { %s1690_s20 = sshll.u32 %s2248_s29, 1  ;;  %p516_p10 = scmp.lt.s32.totalorder %s1692_s23, 7  ;;  %v734_v17 = vld [vmem:[%s2593_s9] sm:$0xff]  ;;  %vm903_vm2 = vcmask 130048   ;;  %v902_v23 = vld [vmem:[%s2590_s6 + $0x8] sm:$0xff] }
  0x34   : > { %s2618_s5 = sld [smem:[#allocation22_spill]]  ;;  %p510_p9 = scmp.lt.s32.totalorder %s1690_s20, 3  ;;  %v901_v19 = vld [vmem:[%s2590_s6] sm:$0xff]  ;;  %v986_v31 = vld [vmem:[%s2592_s8 + $0x8] sm:$0xff] }
  0x35   : > { %s2637_s23 = smov (!%p516_p10, %s1692_s23), 7  ;;  %s2619_s2 = sld [smem:[#allocation19_spill]]  ;;  %v985_v27 = vld [vmem:[%s2592_s8] sm:$0xff] }
  0x36   : > { %s2639_s20 = smov (!%p510_p9, %s1690_s20), 3  ;;  %s1693_s30 = sshll.u32 %s2637_s23, 3 }
  0x37   : > { %s1691_s17 = sshll.u32 %s2639_s20, 3  ;;  %s2620_s1 = sld [smem:[#allocation18_spill]] }
  0x38   : > { %v635_v0 = vld [vmem:[%s2617_s7 + $0x10] sm:$0xff]  ;;  %v634_v1 = vld [vmem:[%s2617_s7 + $0x8] sm:$0xff]  ;;  %v633_v4 = vld [vmem:[%s2617_s7] sm:$0xff]  ;;  %s2621_s3 = sld [smem:[#allocation20_spill]]  ;;  %s2366_s20 = sand.u32 1, %s2138_s26  }
  0x39   : > { %1849 = vmatprep.subr.mxu1 %v635_v0  ;;  %s2622_s4 = sld [smem:[#allocation21_spill]]  ;;  %s1413_s16 = sand.u32 1, %s2248_s29  }
  0x3a   : > { %v546_v2 = vld [vmem:[%s2618_s5] sm:$0xff]  ;;  %1850 = vmatpush3.msra.mxu1 %v635_v0  ;;  %s531_s22 = sld [smem:[#allocation2]]  ;;  %s2411_s7 = scalar_lea.sflag [#allocation7], %s1413_s16 }
  0x3b   : > { %1844 = vmatprep.subr.mxu0 %v546_v2  ;;  %1851 = vmatprep.subr.mxu1 %v634_v1  ;;  %s519_s0 = scalar_lea.vmem %s2619_s2, %s1693_s30  ;;  %s1696_s24 = sld [smem:[#allocation2 + $0x1]] }
  0x3c   : > { %1845 = vmatpush3.msra.mxu0 %v546_v2  ;;  %1852 = vmatpush3.msra.mxu1 %v634_v1  ;;  %v629_v5 = vld [vmem:[%s519_s0] sm:$0xff]  ;;  %v630_v6 = vld [vmem:[%s519_s0 + $0x8] sm:$0xff]  ;;  %v631_v7 = vld [vmem:[%s519_s0 + $0x10] sm:$0xff] }
  0x3d   : > { %1861 = vmatprep.subr.mxu0 %v736_v3  ;;  %1853 = vmatprep.subr.mxu1 %v633_v4  ;;  %s513_s21 = scalar_lea.vmem %s2620_s1, %s1691_s17  ;;  %v632_v11 = vld [vmem:[%s519_s0 + $0x18] sm:$0xff]  ;;  %s1697_s0 = sld [smem:[#allocation2 + $0x2]] }
  0x3e   : > { %1854 = vmatpush3.msra.mxu1 %v633_v4  ;;  %s525_s27 = scalar_lea.vmem %s2621_s3, %s1691_s17  ;;  %1855 = vmatprep.mubr.msk.f32.mxu1 %vm636_vm0, %v629_v5  ;;  %v534_v8 = vld [vmem:[%s513_s21] sm:$0xff]  ;;  %v535_v9 = vld [vmem:[%s513_s21 + $0x8] sm:$0xff]  ;;  %s2380_s21 = sshll.u32 %s2248_s29, 8 }
  0x3f   : > { %v540_v10 = vld [vmem:[%s525_s27] sm:$0xff]  ;;  %1856 = vmatmul.mubr.msk.f32.vlgmr.msra.gmra.mxu1 %vm636_vm0, %v630_v6  ;;  %1973 = vrcp.f32 %v534_v8  ;;  %v541_v12 = vld [vmem:[%s525_s27 + $0x8] sm:$0xff]  ;;  %s2369_s27 = sshll.u32 %s2366_s20, 4  ;;  %s2396_s23 = scalar_lea.hbm %s2595_s11, %s2380_s21 }
  0x40   : > { %1975 = vrcp.f32 %v535_v9  ;;  %1858 = vmatprep.mubr.msk.f32.mxu1 %vm636_vm0, %v631_v7  ;;  %v818_v20 = vld [vmem:[%s2622_s4] sm:$0xff]  ;;  %v819_v26 = vld [vmem:[%s2622_s4 + $0x8] sm:$0xff]  ;;  %s2372_s30 = scalar_lea.vmem [#allocation8], %s2369_s27  ;;  %s494_s17 = scalar_lea.vmem [#allocation6], %s2369_s27  ;;  %v2382_v38 = vstv %s531_s22 }
  0x41   : > { %1977 = vrcp.f32 %v540_v10  ;;  %s1455_s15 = sshll.u32 %s494_s17, 4  ;;  %v2384_v39 = vstv %s1696_s24  ;;  %s2406_s24 = scalar_lea.vmem [#allocation9], %s2369_s27  ;;  %s2388_s15 = int_to_ptr.vmem [resolvable:$true] %s1455_s15 }
  0x42   : > { %1979 = vrcp.f32 %v541_v12  ;;  %s1996_s1 = scalar_lea.vmem %s2388_s15, 256 }
  0x43   : > { %1859 = vmatmul.mubr.msk.f32.gmra.mxu1 %vm636_vm0, %v632_v11  ;;  %v2400_v46 = vstv %s1697_s0  ;;  %p1997_p11 = scmp.ne.s32.totalorder %s2388_s15, %s1996_s1  ;;  %s2149_s0 = smov [#allocation6]  }
  0x44   : > { %1879 = vmatprep.mubr.msk.f32.mxu1 %vm903_vm2, %v901_v19 }
  0x45   : > { %p1998_p12 = pnand %p1997_p11, %p2267_p5 }
  0x47   : > { %p1999_p13 = pneg %p1998_p12 }
  0x4c   : > { %v1974_v13 = vpop.eup %1973 }
  0x4d   : > { %v1976_v14 = vpop.eup %1975  ;;  %1846 = vmatprep.mubr.msk.f32.mxu0 %vm547_vm1, %v1974_v13 }
  0x4e   : > { %v1978_v16 = vpop.eup %1977  ;;  %1847 = vmatmul.mubr.msk.f32.vlgmr.msra.gmra.mxu0 %vm547_vm1, %v1976_v14 }
  0x4f   : > { %1862 = vmatpush3.msra.mxu0 %v736_v3  ;;  %1867 = vmatprep.mubr.msk.f32.mxu0 %vm636_vm0, %v1978_v16  ;;  %v1980_v18 = vpop.eup %1979 }
  0x50   : > { %1863 = vmatprep.subr.mxu0 %v735_v15 }
  0x51   : > { %1864 = vmatpush3.msra.mxu0 %v735_v15 }
  0x52   : > { %1865 = vmatprep.subr.mxu0 %v734_v17 }
  0x53   : > { %1866 = vmatpush3.msra.mxu0 %v734_v17 }
  0x54   : > { %1868 = vmatmul.mubr.msk.f32.vlgmr.msra.gmra.mxu0 %vm636_vm0, %v1980_v18 }
  0x55   : > { %1872 = vmatprep.mubr.msk.f32.mxu0 %vm547_vm1, %v818_v20 }
  0xff   : > { %v1857_v21 = vpop.f32.mrf.mxu1 }
 0x100   : > { %1875 = vmatprep.subr.mxu1 %v1857_v21 }
 0x101   : > { %v715_v22 = vpop.f32.mrf.mxu1  ;;  %1876 = vmatpush3.msra.mxu1 %v1857_v21 }
 0x102   : > { %1877 = vmatprep.subr.mxu1 %v715_v22 }
 0x103   : > { %1878 = vmatpush3.msra.mxu1 %v715_v22  ;;  %v1860_v30 = vpop.f32.mrf.mxu1 }
 0x104   : > { %1880 = vmatmul.mubr.msk.f32.vlgmr.msra.gmra.mxu1 %vm903_vm2, %v902_v23 }
 0x105   : > { %1889 = vmatprep.mubr.msk.f32.mxu1 %vm547_vm1, %v818_v20  ;;  %v725_v32 = vpop.f32.mrf.mxu1 }
 0x10e   : > { %v1848_v24 = vpop.f32.mrf.mxu0 }
 0x10f   : > { %1887 = vmatprep.subr.mxu1 %v1848_v24 }
 0x110   : > { %v620_v25 = vpop.f32.mrf.mxu0  ;;  %1888 = vmatpush3.msra.mxu1 %v1848_v24 }
 0x111   : > { %1870 = vmatprep.subr.mxu0 %v620_v25  ;;  %1890 = vmatmul.mubr.msk.f32.vlgmr.msra.gmra.mxu1 %vm547_vm1, %v819_v26 }
 0x112   : > { %1871 = vmatpush3.msra.mxu0 %v620_v25  ;;  %1901 = vmatprep.mubr.msk.f32.mxu1 %vm547_vm1, %v985_v27 }
 0x113   : > { %1873 = vmatmul.mubr.msk.f32.vlgmr.msra.gmra.mxu0 %vm547_vm1, %v819_v26 }
 0x114   : > { %v1869_v28 = vpop.f32.mrf.mxu0  ;;  %1884 = vmatprep.mubr.msk.f32.mxu0 %vm547_vm1, %v985_v27 }
 0x115   : > { %1899 = vmatprep.subr.mxu1 %v1869_v28 }
 0x116   : > { %v809_v29 = vpop.f32.mrf.mxu0  ;;  %1900 = vmatpush3.msra.mxu1 %v1869_v28 }
 0x117   : > { %1882 = vmatprep.subr.mxu0 %v809_v29  ;;  %1902 = vmatmul.mubr.msk.f32.vlgmr.msra.gmra.mxu1 %vm547_vm1, %v986_v31 }
 0x118   : > { %1883 = vmatpush3.msra.mxu0 %v809_v29 }
 0x119   : > { %1885 = vmatmul.mubr.msk.f32.vlgmr.msra.gmra.mxu0 %vm547_vm1, %v986_v31  ;;  %1892 = vmatprep.subr.mxu0 %v1860_v30 }
 0x11a   : > { %1893 = vmatpush3.msra.mxu0 %v1860_v30  ;;  %1896 = vmatprep.mubr.msk.f32.mxu0 %vm903_vm2, %v901_v19 }
 0x11b   : > { %1894 = vmatprep.subr.mxu0 %v725_v32 }
 0x11c   : > { %1895 = vmatpush3.msra.mxu0 %v725_v32 }
 0x11d   : > { %1897 = vmatmul.mubr.msk.f32.vlgmr.msra.gmra.mxu0 %vm903_vm2, %v902_v23 }
 0x1c4   : > { %v1881_v33 = vpop.f32.mrf.mxu1 }
 0x1c5   : > { %v1073_v44 = vmul.f32 %v1881_v33, %v2384_v39 }
 0x1c6   : > { %v976_v34 = vpop.f32.mrf.mxu1 }
 0x1c7   : > { %v1784_v35 = vpack.c.bf16 %v1881_v33, %v976_v34  ;;  %v1072_v49 = vmul.f32 %v2384_v39, %v976_v34 }
 0x1c9   : > { %1785 = vst [vmem:[%s2372_s30] sm:$0xff] %v1784_v35  }
 0x1d1   : > { %v2376_v36 = vpop.f32.mrf.mxu1 }
 0x1d3   : > { %v1874_v37 = vpop.f32.mrf.mxu0  ;;  %v2386_v40 = vpop.f32.mrf.mxu1 }
 0x1d4   : > { %v1794_v41 = vpack.c.bf16 %v2376_v36, %v2386_v40  ;;  %v1070_v43 = vmul.f32 %v1874_v37, %v2382_v38 }
 0x1d5   : > { %v892_v42 = vpop.f32.mrf.mxu0 }
 0x1d6   : > { %v1779_v45 = vpack.c.bf16 %v1874_v37, %v892_v42  ;;  %1806 = vst [vmem:[%s494_s17 + $0x8] sm:$0xff] %v1794_v41   ;;  %v1069_v48 = vmul.f32 %v2382_v38, %v892_v42 }
 0x1d7   : > { %v1903_v47 = vpop.f32.mrf.mxu1 }
 0x1d8   : > { %1780 = vst [vmem:[%s494_s17] sm:$0xff] %v1779_v45   ;;  %s2000_s17 = sshll.u32 %s2149_s0, 4  ;;  %s2001_s17 = int_to_ptr.vmem [resolvable:$false] %s2000_s17 }
 0x1d9   : > { %v1886_v50 = vpop.f32.mrf.mxu0  ;;  %v2409_v51 = vpop.f32.mrf.mxu1  ;;  %s2002_s2 = scalar_lea.vmem %s2001_s17, 512  ;;  %p2003_p0 = scmp.lt.s32.totalorder %s2388_s15, %s2001_s17 }
 0x1da   : > { %p2004_p1 = scmp.lt.s32.totalorder %s2002_s2, %s1996_s1 }
 0x1dc   : > { %p2005_p2 = por %p2004_p1, %p2003_p0 }
 0x1de   : > { %p2006_p3 = pnand %p2005_p2, %p1999_p13 }
 0x1e0   : > { %2009 = shalt.err (!%p2006_p3)
}
 0x1e1   : > { %s2010_s27 = scalar_lea.hbm %s2396_s23, 256  ;;  %s2014_s0 = scalar_lea.hbm %s2595_s11, 512 }
 0x1e2   : > { %p2011_p4 = scmp.ne.s32.totalorder %s2396_s23, %s2010_s27  ;;  %p2015_p10 = scmp.lt.s32.totalorder %s2396_s23, %s2595_s11 }
 0x1e3   : > { %p2016_p9 = scmp.lt.s32.totalorder %s2014_s0, %s2010_s27 }
 0x1e4   : > { %p2012_p7 = pnand %p2011_p4, %p2267_p5 }
 0x1e5   : > { %p2017_p11 = por %p2016_p9, %p2015_p10 }
 0x1e6   : > { %p2013_p8 = pneg %p2012_p7 }
 0x1e8   : > { %p2018_p12 = pnand %p2017_p11, %p2013_p8 }
 0x1ea   : > { %2021 = shalt.err (!%p2018_p12)
}
 0x1eb   : > { %s2600_s1 = smov 64   ;;  %s2602_s2 = smov 4   ;;  %v1075_v52 = vadd.f32 %v1073_v44, %v1070_v43  ;;  %v1078_v53 = vmul.f32 %v1886_v50, %v2400_v46  ;;  %v1804_v54 = vpack.c.bf16 %v1903_v47, %v2409_v51  ;;  %v1059_v55 = vpop.f32.mrf.mxu0  ;;  %v1074_v56 = vadd.f32 %v1072_v49, %v1069_v48 }
 0x1ec   : > { %1909 = dma.vmem_to_hbm [thread:$0]  (%p2267_p5), %s2388_s15, 256, %s2396_s23, %s2411_s7, %s2600_s1, %s2600_s1, %s2602_s2   ;;  %v1077_v58 = vmul.f32 %v2400_v46, %v1059_v55  ;;  %v1789_v59 = vpack.c.bf16 %v1886_v50, %v1059_v55  ;;  %v1363_v62 = vmul.f32 %v2376_v36, %v2382_v38  ;;  %v1369_v0 = vmul.f32 %v1903_v47, %v2400_v46 }
 0x1ed   : > { %s2623_s3 = sshll.u32 %s2406_s24, 4  ;;  %v1080_v57 = vadd.f32 %v1078_v53, %v1075_v52  ;;  %1808 = vst [vmem:[%s2406_s24 + $0x8] sm:$0xff] %v1804_v54   ;;  %s2449_s22 = scalar_lea.hbm %s2597_s13, %s2380_s21  ;;  %v1898_v60 = vpop.f32.mrf.mxu0  ;;  %s2441_s3 = int_to_ptr.vmem [resolvable:$true] %s2623_s3 }
 0x1ee   : > { %s2624_s17 = sshll.u32 %s2366_s20, 5  ;;  %v1079_v61 = vadd.f32 %v1077_v58, %v1074_v56  ;;  %1790 = vst [vmem:[%s2406_s24] sm:$0xff] %v1789_v59   ;;  %v1365_v63 = vmul.f32 %v1898_v60, %v2384_v39  ;;  %s1424_s0 = scalar_lea.sflag [#allocation10], %s2366_s20 }
 0x1ef   : > { %s2454_s27 = scalar_lea.vmem [#allocation5], %s2624_s17  ;;  %v1270_v1 = vpop.f32.mrf.mxu0  ;;  %s2022_s15 = scalar_lea.vmem %s2441_s3, 256 }
 0x1f0   : > { %1082 = vst [vmem:[%s2454_s27 + $0x8] sm:$0xff] %v1080_v57  ;;  %p2023_p13 = scmp.ne.s32.totalorder %s2441_s3, %s2022_s15  ;;  %s2152_s23 = smov [#allocation9]  }
 0x1f1   : > { %s2026_s17 = sshll.u32 %s2152_s23, 4  ;;  %s2027_s17 = int_to_ptr.vmem [resolvable:$false] %s2026_s17 }
 0x1f2   : > { %p2024_p0 = pnand %p2023_p13, %p2267_p5  ;;  %s2028_s16 = scalar_lea.vmem %s2027_s17, 512 }
 0x1f3   : > { %p2029_p2 = scmp.lt.s32.totalorder %s2441_s3, %s2027_s17  ;;  %p2030_p3 = scmp.lt.s32.totalorder %s2028_s16, %s2022_s15 }
 0x1f4   : > { %p2025_p1 = pneg %p2024_p0 }
 0x1f5   : > { %p2031_p4 = por %p2030_p3, %p2029_p2 }
 0x1f7   : > { %p2032_p7 = pnand %p2031_p4, %p2025_p1 }
 0x1f9   : > { %2035 = shalt.err (!%p2032_p7)
}
 0x1fa   : > { %s2036_s24 = scalar_lea.hbm %s2449_s22, 256  ;;  %s2040_s23 = scalar_lea.hbm %s2597_s13, 512 }
 0x1fb   : > { %p2037_p8 = scmp.ne.s32.totalorder %s2449_s22, %s2036_s24  ;;  %p2041_p11 = scmp.lt.s32.totalorder %s2449_s22, %s2597_s13 }
 0x1fc   : > { %p2042_p12 = scmp.lt.s32.totalorder %s2040_s23, %s2036_s24 }
 0x1fd   : > { %p2038_p10 = pnand %p2037_p8, %p2267_p5 }
 0x1fe   : > { %p2043_p13 = por %p2042_p12, %p2041_p11 }
 0x1ff   : > { %p2039_p9 = pneg %p2038_p10 }
 0x201   : > { %p2044_p0 = pnand %p2043_p13, %p2039_p9 }
 0x203   : > { %2047 = shalt.err (!%p2044_p0)
}
 0x204   : > { %s2625_s16 = smov 4   ;;  %s2626_s15 = smov 64   ;;  %1081 = vst [vmem:[%s2454_s27] sm:$0xff] %v1079_v61  ;;  %v1362_v2 = vmul.f32 %v2386_v40, %v2382_v38  ;;  %v1367_v3 = vadd.f32 %v1365_v63, %v1363_v62  ;;  %v1364_v4 = vmul.f32 %v1270_v1, %v2384_v39  ;;  %v1799_v5 = vpack.c.bf16 %v1898_v60, %v1270_v1 }
 0x205   : > { %1911 = dma.vmem_to_hbm [thread:$0]  (%p2267_p5), %s2441_s3, 256, %s2449_s22, %s1424_s0, %s2626_s15, %s2626_s15, %s2625_s16   ;;  %v1368_v8 = vmul.f32 %v2409_v51, %v2400_v46 }
 0x206   : > { %s2627_s4 = sshll.u32 %s2372_s30, 4  ;;  %s2499_s5 = scalar_lea.hbm %s2596_s12, %s2380_s21  ;;  %v1366_v6 = vadd.f32 %v1364_v4, %v1362_v2  ;;  %1807 = vst [vmem:[%s2372_s30 + $0x8] sm:$0xff] %v1799_v5   ;;  %v1371_v7 = vadd.f32 %v1369_v0, %v1367_v3  ;;  %s2489_s4 = int_to_ptr.vmem [resolvable:$true] %s2627_s4 }
 0x207   : > { %s2628_s22 = sshll.u32 %s2454_s27, 4  ;;  %s2048_s0 = scalar_lea.vmem %s2489_s4, 256  ;;  %s2504_s22 = int_to_ptr.vmem [resolvable:$true] %s2628_s22 }
 0x208   : > { %p2049_p1 = scmp.ne.s32.totalorder %s2489_s4, %s2048_s0  ;;  %s2153_s17 = smov [#allocation8]  }
 0x209   : > { %s2052_s24 = sshll.u32 %s2153_s17, 4  ;;  %s2053_s24 = int_to_ptr.vmem [resolvable:$false] %s2052_s24 }
 0x20a   : > { %p2050_p2 = pnand %p2049_p1, %p2267_p5  ;;  %s2054_s21 = scalar_lea.vmem %s2053_s24, 512 }
 0x20b   : > { %p2055_p4 = scmp.lt.s32.totalorder %s2489_s4, %s2053_s24  ;;  %p2056_p7 = scmp.lt.s32.totalorder %s2054_s21, %s2048_s0 }
 0x20c   : > { %p2051_p3 = pneg %p2050_p2 }
 0x20d   : > { %p2057_p8 = por %p2056_p7, %p2055_p4 }
 0x20f   : > { %p2058_p10 = pnand %p2057_p8, %p2051_p3 }
 0x211   : > { %2061 = shalt.err (!%p2058_p10)
}
 0x212   : > { %s2062_s30 = scalar_lea.hbm %s2499_s5, 256  ;;  %s2066_s2 = scalar_lea.hbm %s2596_s12, 512 }
 0x213   : > { %p2063_p9 = scmp.ne.s32.totalorder %s2499_s5, %s2062_s30  ;;  %p2067_p13 = scmp.lt.s32.totalorder %s2499_s5, %s2596_s12 }
 0x214   : > { %p2068_p0 = scmp.lt.s32.totalorder %s2066_s2, %s2062_s30 }
 0x215   : > { %p2064_p11 = pnand %p2063_p9, %p2267_p5 }
 0x216   : > { %p2069_p1 = por %p2068_p0, %p2067_p13 }
 0x217   : > { %p2065_p12 = pneg %p2064_p11 }
 0x219   : > { %p2070_p2 = pnand %p2069_p1, %p2065_p12 }
 0x21b   : > { %2073 = shalt.err (!%p2070_p2)
}
 0x21c   : > { %1910 = dma.vmem_to_hbm [thread:$0]  (%p2267_p5), %s2489_s4, 256, %s2499_s5, %s2411_s7, %s2626_s15, %s2626_s15, %s2625_s16   ;;  %v1370_v9 = vadd.f32 %v1368_v8, %v1366_v6 }
 0x21d   : > { %1725 = vst [vmem:[%s2454_s27 + $0x18] sm:$0xff] %v1371_v7  ;;  %s2629_s3 = sshll.u32 %s2248_s29, 9  ;;  %s1409_s30 = scalar_lea.sflag [#allocation3], %s2366_s20 }
 0x21e   : > { %s2539_s21 = scalar_lea.hbm %s2594_s10, %s2629_s3  ;;  %1724 = vst [vmem:[%s2454_s27 + $0x10] sm:$0xff] %v1370_v9  ;;  %s2074_s23 = scalar_lea.vmem %s2504_s22, 512 }
 0x21f   : > { %p2075_p3 = scmp.ne.s32.totalorder %s2504_s22, %s2074_s23  ;;  %s2154_s1 = smov [#allocation5]  }
 0x220   : > { %s2078_s2 = sshll.u32 %s2154_s1, 4  ;;  %s2079_s2 = int_to_ptr.vmem [resolvable:$false] %s2078_s2 }
 0x221   : > { %p2076_p4 = pnand %p2075_p3, %p2267_p5  ;;  %s2080_s17 = scalar_lea.vmem %s2079_s2, 1024 }
 0x222   : > { %p2081_p8 = scmp.lt.s32.totalorder %s2504_s22, %s2079_s2  ;;  %p2082_p10 = scmp.lt.s32.totalorder %s2080_s17, %s2074_s23 }
 0x223   : > { %p2077_p7 = pneg %p2076_p4 }
 0x224   : > { %p2083_p9 = por %p2082_p10, %p2081_p8 }
 0x226   : > { %p2084_p11 = pnand %p2083_p9, %p2077_p7 }
 0x228   : > { %2087 = shalt.err (!%p2084_p11)
}
 0x229   : > { %s2088_s29 = scalar_lea.hbm %s2539_s21, 512  ;;  %s2092_s16 = scalar_lea.hbm %s2594_s10, 1024 }
 0x22a   : > { %p2089_p12 = scmp.ne.s32.totalorder %s2539_s21, %s2088_s29  ;;  %p2093_p1 = scmp.lt.s32.totalorder %s2539_s21, %s2594_s10 }
 0x22b   : > { %p2094_p2 = scmp.lt.s32.totalorder %s2092_s16, %s2088_s29 }
 0x22c   : > { %p2090_p13 = pnand %p2089_p12, %p2267_p5 }
 0x22d   : > { %p2095_p3 = por %p2094_p2, %p2093_p1 }
 0x22e   : > { %p2091_p0 = pneg %p2090_p13 }
 0x230   : > { %p2096_p4 = pnand %p2095_p3, %p2091_p0 }
 0x232   : > { %2099 = shalt.err (!%p2096_p4)
}
 0x233   : > { %s2155_s5 = smov 128   ;;  %s2156_s3 = smov 8  }
 0x234   : > { %1908 = dma.vmem_to_hbm [thread:$0]  (%p2267_p5), %s2504_s22, 512, %s2539_s21, %s1409_s30, %s2155_s5, %s2155_s5, %s2156_s3  }
 0x235 PF: > { %p1935_p7 = scmp.ge.s32.totalorder %s2146_s28, 2  ;;  %s1504_s0 = sand.u32 1, %s2134_s25  }
 0x236   : > { %s1505_s24 = scalar_lea.sflag [#allocation3], %s1504_s0 }
 0x237   : > { %p1921_p8 = pnand %p1935_p7, %p2271_p6 }
 0x239   : > { %p1922_p10 = pneg %p1921_p8 }
 0x23b   : > { %2121 = dma.done.wait (%p1922_p10), %s1505_s24, 512  }
 0x23c   : > { %2123 = vsyncadd (%p1922_p10), %s1505_s24, 4294966784  ;;  %s2630_s23 = sadd.s32 4294967294, %s2146_s28  }
 0x23d   : > { %s1513_s1 = sand.u32 1, %s2630_s23  }
 0x23e   : > { %s1514_s2 = scalar_lea.sflag [#allocation7], %s1513_s1 }
 0x23f   : > { %2125 = dma.done.wait (%p1922_p10), %s1514_s2, 512  }
 0x240   : > { %2127 = vsyncadd (%p1922_p10), %s1514_s2, 4294966784  ;;  %s1532_s18 = scalar_lea.sflag [#allocation10], %s1504_s0 }
 0x241   : > { %2129 = dma.done.wait (%p1922_p10), %s1532_s18, 256  }
 0x242   : > { %2131 = vsyncadd (%p1922_p10), %s1532_s18, 4294967040  ;;  %s2631_s20 = sld [smem:[#allocation15_spill]]  ;;  %p31_p5 = scmp.ge.s32.totalorder %s2252_s14, 4  }
 0x243   : > { %s2632_s27 = sld [smem:[#allocation16_spill]]  ;;  %s2633_s25 = smov %s2138_s26 }
 0x244   : > { %s2635_s28 = smov %s2252_s14  ;;  %33 = sbr.rel (!%p31_p5) target bundleno = 16 (0x10), region = 159 }
 0x248   : > { %s2634_s26 = smov %s2631_s20 }
 0x249   :  { %1537 = vsyncpa [#allocation3], 1 }
 0x24a   :  { %1539 = vsyncpa [#allocation3 + $0x1], 1 }
 0x24b   :  { %1540 = vsyncpa [#allocation7], 1 }
 0x24c   :  { %1542 = vsyncpa [#allocation7 + $0x1], 1 }
 0x24d   :  { %1543 = vsyncpa [#allocation10], 1 }
 0x24e   :  { %1545 = vsyncpa [#allocation10 + $0x1], 1 }
 0x24f   :  { %1546 = vsyncpa [#allocation4], 1 }
 0x250   :  { %1548 = vsyncpa [#allocation4 + $0x1], 1 }

</bundles_post_ra>
